<compile_context>
chip_gen: v6e
topology: v6e:2x2x1
jax: 0.10.0
libtpu: 0.0.40
codegen_flags: <defaults>
</compile_context>

<pallas_src>
import functools
import math

import jax
import jax.numpy as jnp
from jax.experimental import pallas as pl
from jax.experimental.pallas import tpu as pltpu

ACOSH_EPS = 1e-7   # clamp for alpha^2 - 1 (mirrors the clamped arcosh in the torch helpers)
NORM_EPS = 1e-12   # F.normalize denominator clamp


def _round_up(x, m):
    return (x + m - 1) // m * m


# --- shared math helpers (used by both the kernel body and the JAX reference) ---

def _acosh_over_sqrt(alpha):
    """arcosh(alpha) / sqrt(alpha^2 - 1), eps-clamped like the torch helpers."""
    sq = jnp.sqrt(jnp.maximum(alpha * alpha - 1.0, ACOSH_EPS))
    return jnp.log(alpha + sq) / sq


def _cosh_sinh(r):
    e = jnp.exp(r)
    einv = jnp.exp(-r)
    return 0.5 * (e + einv), 0.5 * (e - einv)


# ----------------------------- Pallas kernel -----------------------------

def _hyperbolic_linear_kernel(x_ref, wt_ref, o_ref, acc_ref, coef_ref, *, radius):
    """Grid = (batch_tiles, k_tiles).  acc/coef persist across the K axis."""
    k = pl.program_id(1)
    nk = pl.num_programs(1)
    R = jnp.float32(radius)

    @pl.when(k == 0)
    def _init():
        acc_ref[...] = jnp.zeros_like(acc_ref)
        # time coordinate lives in global column 0, i.e. in the first K chunk
        alpha = x_ref[:, 0:1].astype(jnp.float32) / R          # (TB, 1)
        coef_ref[...] = _acosh_over_sqrt(alpha)

    # inverse_exp_map_mu0: u = coef * x.  The time component of u is analytically
    # zero; instead of masking it we zero row 0 of W^T in the wrapper, so the
    # x0 contribution vanishes exactly inside the matmul.
    u = (coef_ref[...] * x_ref[...].astype(jnp.float32)).astype(x_ref.dtype)
    acc_ref[...] += jnp.dot(u, wt_ref[...], preferred_element_type=jnp.float32)

    @pl.when(k == nk - 1)
    def _epilogue():
        # Column 0 of W^T is zeroed in the wrapper, so z[:, 0] == 0: z is already
        # the tangent vector exp_map_mu0 acts on.  inverse_exp_map_mu0 ∘
        # exp_map_mu0 is the identity on that tangent vector (outside the arcosh
        # eps-clamp regime), so hyper_act reduces to ReLU + one exp_map.
        z = acc_ref[...]                                        # (TB, Dout_p) f32
        s = jnp.maximum(z, 0.0)                                 # ReLU in tangent space
        snorm = jnp.sqrt(jnp.sum(s * s, axis=-1, keepdims=True))
        r = snorm / R
        cosh_r, sinh_r = _cosh_sinh(r)
        h_tail = (sinh_r * R / jnp.maximum(snorm, NORM_EPS)) * s
        col = jax.lax.broadcasted_iota(jnp.int32, s.shape, 1)
        h = jnp.where(col == 0, cosh_r * R, h_tail)             # on H^{Dout-1}_R
        o_ref[...] = h.astype(o_ref.dtype)


# ----------------------------- wrapper -----------------------------

def _padded_dims(din, dout, block_k):
    din_p = _round_up(din, 128)
    tk = din_p if din_p <= block_k else block_k
    din_p = _round_up(din_p, tk)
    dout_p = _round_up(dout, 128)
    return din_p, dout_p, tk


def prepare_hyperbolic_weight(weight, *, compute_dtype=None, block_k=512):
    """Transpose/pad/cast the weight once (cache the result per layer).

    Row 0 (input time feature) and column 0 (output time slot, discarded by
    exp_map_mu0) of W^T are zeroed so the kernel needs no iota masks.
    """
    dout, din = weight.shape
    cd = compute_dtype or weight.dtype
    din_p, dout_p, _ = _padded_dims(din, dout, block_k)
    wt_p = jnp.zeros((din_p, dout_p), cd)
    wt_p = wt_p.at[1:din, 1:dout].set(weight[1:, 1:].T.astype(cd))
    return wt_p


def _pick_vmem_limit(est_bytes):
    try:
        cap = int(pltpu.get_tpu_info().vmem_capacity_bytes)
    except Exception:
        cap = 64 * 1024 * 1024          # v7x physical floor among targets
    limit = max(int(est_bytes * 1.5), 32 * 1024 * 1024)
    return min(limit, int(cap * 0.9))


def hyperbolic_linear_forward(x, weight, radius, *, block_b=256, block_k=512,
                              compute_dtype=None, prepared_weight=None):
    """HyperbolicLinear.forward (use_bias=False).

    x: (B, Din) points on H^{Din-1}_R.  weight: (Dout, Din).
    Returns h: (B, Dout) points on H^{Dout-1}_R.
    Pass compute_dtype=jnp.bfloat16 for native v6e/v7x MXU rate (f32 accumulate).
    """
    # TODO(synk): the use_bias=True branch (parallel_transport_mu0 of the bias
    # followed by exp_map at x) is not implemented; the module default is use_bias=False.
    B, Din = x.shape
    Dout = weight.shape[0]
    cd = compute_dtype or x.dtype
    din_p, dout_p, tk = _padded_dims(Din, Dout, block_k)

    # Batch tile: multiple of 8, capped by block_b; keep >= 2 grid steps when
    # possible so the "parallel" batch axis can shard across v7x's two TCs.
    b8 = _round_up(B, 8)
    tb = min(block_b, b8)
    if b8 // tb < 2 and B > 8:
        tb = _round_up((b8 + 1) // 2, 8)
    b_p = _round_up(B, tb)
    nb, nk = b_p // tb, din_p // tk

    # Pad / cast x only when required (skip the extra HBM pass when aligned).
    if (b_p, din_p) == (B, Din) and x.dtype == jnp.dtype(cd):
        x_p = x
    else:
        x_p = jnp.zeros((b_p, din_p), cd).at[:B, :Din].set(x.astype(cd))

    if prepared_weight is not None:
        if prepared_weight.shape != (din_p, dout_p):
            raise ValueError("prepared_weight shape does not match padded dims")
        wt_p = prepared_weight.astype(cd) if prepared_weight.dtype != jnp.dtype(cd) \
            else prepared_weight
    else:
        wt_p = prepare_hyperbolic_weight(weight, compute_dtype=cd, block_k=block_k)

    cd_size = jnp.dtype(cd).itemsize
    out_size = jnp.dtype(x.dtype).itemsize
    est = (2 * tb * tk * cd_size            # x tiles (double buffered)
           + 2 * tk * dout_p * cd_size      # W^T tiles (double buffered)
           + 2 * tb * dout_p * out_size     # output tiles
           + (tb * dout_p + tb * 128) * 4   # f32 accumulator + coef scratch
           + 6 * tb * dout_p * 4)           # epilogue temporaries headroom

    kernel = functools.partial(_hyperbolic_linear_kernel, radius=float(radius))
    h_p = pl.pallas_call(
        kernel,
        grid_spec=pltpu.PrefetchScalarGridSpec(
            num_scalar_prefetch=0,
            grid=(nb, nk),
            in_specs=[
                pl.BlockSpec((tb, tk), lambda i, k: (i, k)),        # x: batch x K tiles
                pl.BlockSpec((tk, dout_p), lambda i, k: (k, 0)),    # W^T: K tiles
            ],
            out_specs=pl.BlockSpec((tb, dout_p), lambda i, k: (i, 0)),
            scratch_shapes=[
                pltpu.VMEM((tb, dout_p), jnp.float32),              # z accumulator
                pltpu.VMEM((tb, 1), jnp.float32),                   # log-map coefficient
            ],
        ),
        out_shape=jax.ShapeDtypeStruct((b_p, dout_p), x.dtype),
        compiler_params=pltpu.CompilerParams(
            dimension_semantics=("parallel", "arbitrary"),
            vmem_limit_bytes=_pick_vmem_limit(est),
        ),
    )(x_p, wt_p)

    if (b_p, dout_p) == (B, Dout):
        return h_p
    return h_p[:B, :Dout]


# ----------------------------- pure-JAX reference (full torch path) -----------------------------

def _inverse_exp_map_mu0(x, R):
    alpha = x[..., 0:1] / R
    coef = _acosh_over_sqrt(alpha)
    diff = jnp.concatenate([jnp.zeros_like(alpha), x[..., 1:]], axis=-1)
    return coef * diff


def _exp_map_mu0(u, R):
    v = u[..., 1:]
    vnorm = jnp.sqrt(jnp.sum(v * v, axis=-1, keepdims=True))
    r = vnorm / R
    cosh_r, sinh_r = _cosh_sinh(r)
    v_hat = v / jnp.maximum(vnorm, NORM_EPS) * R
    return jnp.concatenate([cosh_r * R, sinh_r * v_hat], axis=-1)


def hyperbolic_linear_reference(x, weight, radius):
    R = jnp.float32(radius)
    u = _inverse_exp_map_mu0(x, R)
    y = _exp_map_mu0(u @ weight.T, R)          # forward output
    t = _inverse_exp_map_mu0(y, R)             # hyper_act: full round trip
    s = jax.nn.relu(t)
    return _exp_map_mu0(s, R)


# ----------------------------- demo / checks -----------------------------

if __name__ == "__main__":
    radius = 1.0

    def make_inputs(key, B, Din, Dout, scale):
        k1, k2 = jax.random.split(key)
        tangent = jnp.concatenate(
            [jnp.zeros((B, 1), jnp.float32),
             scale * jax.random.normal(k1, (B, Din - 1), dtype=jnp.float32)], axis=-1)
        x = _exp_map_mu0(tangent, jnp.float32(radius))       # valid hyperboloid points
        # Xavier-uniform with gain sqrt(2), matching reset_parameters().
        limit = math.sqrt(2.0) * math.sqrt(6.0 / (Din + Dout))
        weight = jax.random.uniform(k2, (Dout, Din), jnp.float32, -limit, limit)
        return x, weight

    key = jax.random.PRNGKey(0)
    k1, k2 = jax.random.split(key)

    # --- test 1: small layer, f32 compute, cached pre-transposed/padded weight ---
    x1, w1 = make_inputs(k1, 16, 8, 8, 0.5)
    w1_prep = prepare_hyperbolic_weight(w1)                   # hoisted out of the call path
    h1 = hyperbolic_linear_forward(x1, w1, radius, prepared_weight=w1_prep)
    jax.block_until_ready(h1)
    h1_ref = hyperbolic_linear_reference(x1, w1, radius)
    assert h1.shape == (16, 8)
    assert bool(jnp.all(jnp.isfinite(h1))), "non-finite output (f32)"
    assert jnp.allclose(h1, h1_ref, atol=1e-4, rtol=1e-4), (
        f"f32 mismatch, max abs err = {jnp.max(jnp.abs(h1 - h1_ref))}")

    # --- test 2: K-tiled reduction path (Din_p > block_k), 2x2 grid ---
    x2, w2 = make_inputs(k2, 12, 200, 24, 1.0 / math.sqrt(200.0))
    h2 = hyperbolic_linear_forward(x2, w2, radius, block_b=8, block_k=128)
    jax.block_until_ready(h2)
    h2_ref = hyperbolic_linear_reference(x2, w2, radius)
    assert h2.shape == (12, 24)
    assert bool(jnp.all(jnp.isfinite(h2))), "non-finite output (K-tiled)"
    assert jnp.allclose(h2, h2_ref, atol=1e-4, rtol=1e-4), (
        f"K-tiled mismatch, max abs err = {jnp.max(jnp.abs(h2 - h2_ref))}")

    # --- test 3: bf16 MXU operands (native v6e/v7x rate), f32 accumulate ---
    h3 = hyperbolic_linear_forward(x1, w1, radius, compute_dtype=jnp.bfloat16)
    jax.block_until_ready(h3)
    assert bool(jnp.all(jnp.isfinite(h3))), "non-finite output (bf16)"
    assert jnp.allclose(h3, h1_ref, atol=1e-1, rtol=1e-1), (
        f"bf16 mismatch, max abs err = {jnp.max(jnp.abs(h3 - h1_ref))}")

    print("KERNEL_OK")
</pallas_src>

<mosaic_0001>
module attributes {stable_mosaic.version = 11 : i64} {
  func.func @_hyperbolic_linear_kernel(%arg0: i32, %arg1: i32, %arg2: memref<8x128xf32, #tpu.memory_space<vmem>>, %arg3: memref<128x128xf32, #tpu.memory_space<vmem>>, %arg4: memref<8x128xf32, #tpu.memory_space<vmem>>, %arg5: memref<8x128xf32, #tpu.memory_space<vmem>>, %arg6: memref<8x1xf32, #tpu.memory_space<vmem>>) attributes {dimension_semantics = [#tpu.dimension_semantics<parallel>, #tpu.dimension_semantics<arbitrary>], iteration_bounds = array<i64: 2, 1>, scalar_prefetch = 0 : i64, scratch_operands = 2 : i64, tpu.core_type = #tpu.core_type<tc>, window_params = [{transform_indices = @transform_0, window_bounds = array<i64: 8, 128>}, {transform_indices = @transform_1, window_bounds = array<i64: 128, 128>}, {transform_indices = @transform_2, window_bounds = array<i64: 8, 128>}]} {
    %c0_i32 = arith.constant 0 : i32
    %0 = arith.cmpi eq, %arg1, %c0_i32 : i32
    %1 = arith.extui %0 : i1 to i32
    %cst = arith.constant 1.000000e+00 : f32
    %c0_i32_0 = arith.constant 0 : i32
    %2 = arith.cmpi ne, %1, %c0_i32_0 : i32
    scf.if %2 {
      %cst_14 = arith.constant 0.000000e+00 : f32
      %15 = vector.broadcast %cst_14 : f32 to vector<8x128xf32>
      %c0_15 = arith.constant 0 : index
      %c0_16 = arith.constant 0 : index
      %16 = vector.load %arg5[%c0_15, %c0_16] : memref<8x128xf32, #tpu.memory_space<vmem>>, vector<8x128xf32>
      tpu.vector_store %arg5[%c0_15, %c0_16], %15 {strides = array<i32>} : memref<8x128xf32, #tpu.memory_space<vmem>>, vector<8x128xf32>,
      %c0_17 = arith.constant 0 : index
      %c0_18 = arith.constant 0 : index
      %17 = vector.load %arg2[%c0_17, %c0_18] : memref<8x128xf32, #tpu.memory_space<vmem>>, vector<8x1xf32>
      %18 = vector.broadcast %cst : f32 to vector<8x1xf32>
      %19 = arith.divf %17, %18 : vector<8x1xf32>
      %20 = arith.mulf %19, %19 : vector<8x1xf32>
      %cst_19 = arith.constant 1.000000e+00 : f32
      %21 = vector.broadcast %cst_19 : f32 to vector<8x1xf32>
      %22 = arith.subf %20, %21 : vector<8x1xf32>
      %cst_20 = arith.constant 1.000000e-07 : f32
      %23 = vector.broadcast %cst_20 : f32 to vector<8x1xf32>
      %24 = arith.maximumf %22, %23 : vector<8x1xf32>
      %25 = math.sqrt %24 : vector<8x1xf32>
      %26 = arith.addf %19, %25 : vector<8x1xf32>
      %27 = math.log %26 : vector<8x1xf32>
      %28 = arith.divf %27, %25 : vector<8x1xf32>
      %c0_21 = arith.constant 0 : index
      %c0_22 = arith.constant 0 : index
      %29 = vector.load %arg6[%c0_21, %c0_22] : memref<8x1xf32, #tpu.memory_space<vmem>>, vector<8x1xf32>
      tpu.vector_store %arg6[%c0_21, %c0_22], %28 {strides = array<i32>} : memref<8x1xf32, #tpu.memory_space<vmem>>, vector<8x1xf32>,
    } else {
    }
    %c0 = arith.constant 0 : index
    %c0_1 = arith.constant 0 : index
    %3 = vector.load %arg6[%c0, %c0_1] : memref<8x1xf32, #tpu.memory_space<vmem>>, vector<8x1xf32>
    %c0_2 = arith.constant 0 : index
    %c0_3 = arith.constant 0 : index
    %4 = vector.load %arg2[%c0_2, %c0_3] : memref<8x128xf32, #tpu.memory_space<vmem>>, vector<8x128xf32>
    %5 = vector.broadcast %3 : vector<8x1xf32> to vector<8x128xf32>
    %6 = arith.mulf %5, %4 : vector<8x128xf32>
    %c0_4 = arith.constant 0 : index
    %c0_5 = arith.constant 0 : index
    %7 = vector.load %arg5[%c0_4, %c0_5] : memref<8x128xf32, #tpu.memory_space<vmem>>, vector<8x128xf32>
    %c0_6 = arith.constant 0 : index
    %c0_7 = arith.constant 0 : index
    %8 = vector.load %arg3[%c0_6, %c0_7] : memref<128x128xf32, #tpu.memory_space<vmem>>, vector<128x128xf32>
    %cst_8 = arith.constant dense<0.000000e+00> : vector<8x128xf32>
    %9 = tpu.matmul %6, %8, %cst_8 {dimension_numbers = #tpu.dot_dimension_numbers<[1], [0], [0], [1], [0, 0, 1, 1], [], []>} : vector<8x128xf32>, vector<128x128xf32>, vector<8x128xf32> -> vector<8x128xf32>
    %10 = arith.addf %7, %9 : vector<8x128xf32>
    %c0_9 = arith.constant 0 : index
    %c0_10 = arith.constant 0 : index
    %11 = vector.load %arg5[%c0_9, %c0_10] : memref<8x128xf32, #tpu.memory_space<vmem>>, vector<8x128xf32>
    tpu.vector_store %arg5[%c0_9, %c0_10], %10 {strides = array<i32>} : memref<8x128xf32, #tpu.memory_space<vmem>>, vector<8x128xf32>,
    %c0_i32_11 = arith.constant 0 : i32
    %12 = arith.cmpi eq, %arg1, %c0_i32_11 : i32
    %13 = arith.extui %12 : i1 to i32
    %cst_12 = arith.constant 1.000000e+00 : f32
    %c0_i32_13 = arith.constant 0 : i32
    %14 = arith.cmpi ne, %13, %c0_i32_13 : i32
    scf.if %14 {
      %c0_14 = arith.constant 0 : index
      %c0_15 = arith.constant 0 : index
      %15 = vector.load %arg5[%c0_14, %c0_15] : memref<8x128xf32, #tpu.memory_space<vmem>>, vector<8x128xf32>
      %cst_16 = arith.constant 0.000000e+00 : f32
      %16 = vector.broadcast %cst_16 : f32 to vector<8x128xf32>
      %17 = arith.maximumf %15, %16 : vector<8x128xf32>
      %18 = arith.mulf %17, %17 : vector<8x128xf32>
      %cst_17 = arith.constant dense<0.000000e+00> : vector<8xf32>
      %19 = vector.multi_reduction <add>, %18, %cst_17 [1] : vector<8x128xf32> to vector<8xf32>
      %20 = vector.shape_cast %19 : vector<8xf32> to vector<8x1xf32>
      %21 = math.sqrt %20 : vector<8x1xf32>
      %22 = vector.broadcast %cst_12 : f32 to vector<8x1xf32>
      %23 = arith.divf %21, %22 : vector<8x1xf32>
      %24 = math.exp %23 : vector<8x1xf32>
      %cst_18 = arith.constant 0.000000e+00 : f32
      %25 = vector.broadcast %cst_18 : f32 to vector<8x1xf32>
      %26 = arith.subf %25, %23 : vector<8x1xf32>
      %27 = math.exp %26 : vector<8x1xf32>
      %28 = arith.addf %24, %27 : vector<8x1xf32>
      %cst_19 = arith.constant 5.000000e-01 : f32
      %29 = vector.broadcast %cst_19 : f32 to vector<8x1xf32>
      %30 = arith.mulf %29, %28 : vector<8x1xf32>
      %31 = arith.subf %24, %27 : vector<8x1xf32>
      %cst_20 = arith.constant 5.000000e-01 : f32
      %32 = vector.broadcast %cst_20 : f32 to vector<8x1xf32>
      %33 = arith.mulf %32, %31 : vector<8x1xf32>
      %34 = vector.broadcast %cst_12 : f32 to vector<8x1xf32>
      %35 = arith.mulf %33, %34 : vector<8x1xf32>
      %cst_21 = arith.constant 9.99999996E-13 : f32
      %36 = vector.broadcast %cst_21 : f32 to vector<8x1xf32>
      %37 = arith.maximumf %21, %36 : vector<8x1xf32>
      %38 = arith.divf %35, %37 : vector<8x1xf32>
      %39 = vector.broadcast %38 : vector<8x1xf32> to vector<8x128xf32>
      %40 = arith.mulf %39, %17 : vector<8x128xf32>
      %41 = tpu.iota {dimensions = array<i32: 1>} : vector<8x128xi32>
      %c0_i32_22 = arith.constant 0 : i32
      %42 = vector.broadcast %c0_i32_22 : i32 to vector<8x128xi32>
      %43 = arith.cmpi eq, %41, %42 : vector<8x128xi32>
      %44 = vector.broadcast %cst_12 : f32 to vector<8x1xf32>
      %45 = arith.mulf %30, %44 : vector<8x1xf32>
      %46 = vector.shape_cast %45 : vector<8x1xf32> to vector<8x1xf32>
      %47 = vector.broadcast %46 : vector<8x1xf32> to vector<8x128xf32>
      %48 = arith.select %43, %47, %40 : vector<8x128xi1>, vector<8x128xf32>
      %c0_23 = arith.constant 0 : index
      %c0_24 = arith.constant 0 : index
      %49 = vector.load %arg4[%c0_23, %c0_24] : memref<8x128xf32, #tpu.memory_space<vmem>>, vector<8x128xf32>
      tpu.vector_store %arg4[%c0_23, %c0_24], %48 {strides = array<i32>} : memref<8x128xf32, #tpu.memory_space<vmem>>, vector<8x128xf32>,
    } else {
    }
    return
  }
  func.func @transform_0(%arg0: i32, %arg1: i32) -> (i32, i32) {
    %c0_i32 = arith.constant 0 : i32
    return %arg0, %arg1 : i32, i32
  }
  func.func @transform_1(%arg0: i32, %arg1: i32) -> (i32, i32) {
    %c0_i32 = arith.constant 0 : i32
    %c0_i32_0 = arith.constant 0 : i32
    return %arg1, %c0_i32 : i32, i32
  }
  func.func @transform_2(%arg0: i32, %arg1: i32) -> (i32, i32) {
    %c0_i32 = arith.constant 0 : i32
    %c0_i32_0 = arith.constant 0 : i32
    return %arg0, %c0_i32 : i32, i32
  }
}

</mosaic_0001>

<bundles_post_ra>
// kernel: tpu_custom_call.1
= control target key start
LH: loop header
LB: loop body
LE: loop exit
PB: predicated region body
PF: predicated region fallthrough
CT: control target
= control target key end

     0   :  { %7 = vsyncpa [#allocation5], 0  ;;  %s980_s0 = inlined_call_operand.hbm [shape: f32[16,128], index: 0, kind: input, shape index: {}]   ;;  %s981_s1 = inlined_call_operand.hbm [shape: f32[128,128], index: 1, kind: input, shape index: {}]   ;;  %s982_s2 = inlined_call_operand.hbm [shape: f32[16,128], index: 2, kind: output, shape index: {}]  }
   0x1   :  { %9 = vsyncpa [#allocation5 + $0x1], 0 }
   0x2   :  { %10 = vsyncpa [#allocation8], 0 }
   0x3   :  { %11 = vsyncpa [#allocation6], 0 }
   0x4   :  { %13 = vsyncpa [#allocation6 + $0x1], 0  ;;  %s780_s9 = smov 0   ;;  %s782_s10 = smov 0  }
   0x5   :  { %s784_s11 = smov 0   ;;  %s786_s12 = smov 0  }
   0x6   :  { %s788_s13 = smov 0   ;;  %s790_s14 = smov 0  }
   0x7 LB: > { %s456_s15 = sadd.s32 4294967295, %s755_s14   ;;  %s457_s16 = sadd.s32 4294967294, %s755_s14   ;;  %s755_s14 = sphi %s790_s14, %s19_s14   ;;  %s751_s13 = sphi %s788_s13, %s1000_s13   ;;  %s747_s12 = sphi %s786_s12, %s999_s12   ;;  %s743_s11 = sphi %s784_s11, %s998_s11   ;;  %s739_s10 = sphi %s782_s10, %s997_s10   ;;  %s735_s9 = sphi %s780_s9, %s996_s9  }
   0x8   : > { %p53_p0 = scmp.ne.s32.totalorder %s739_s10, %s735_s9  ;;  %p814_p1 = scmp.eq.s32.totalorder %s456_s15, 0 }
   0x9   : > { %p818_p2 = scmp.eq.s32.totalorder %s456_s15, 1  ;;  %p109_p3 = scmp.eq.s32.totalorder %s457_s16, 1 }
   0xa   : > { %p824_p4 = por %p814_p1, %p53_p0  ;;  %p458_p5 = scmp.ge.s32.totalorder %s755_s14, 1 }
   0xb   : > { %p829_p6 = por %p109_p3, %p53_p0  ;;  %p116_p7 = scmp.lt.s32.totalorder %s755_s14, 3 }
   0xc   : > { %s986_s19 = scalar_select %p824_p4, 1, 0 }
   0xd   : > { %s987_s20 = scalar_select %p829_p6, 1, 0 }
   0xe   : > { %p834_p8 = pnand %p458_p5, %p116_p7  ;;  %s757_s22 = smov [#allocation7]  }
   0xf   : > { %s131_s23 = sshll.u32 %s757_s22, 4  ;;  %s31_s25 = sadd.s32 1, %s751_s13  ;;  %s132_s23 = int_to_ptr.vmem [resolvable:$true] %s131_s23 }
  0x10   : > { %p532_p9 = pneg %p834_p8  ;;  %s628_s26 = scalar_lea.vmem %s132_s23, 2048 }
  0x11   : > { %p629_p13 = scmp.ne.s32.totalorder %s132_s23, %s628_s26  ;;  %p636_p5 = scmp.lt.s32.totalorder %s132_s23, %s132_s23 }
  0x12   : > { %p843_p11 = pnand %p532_p9, %p814_p1  ;;  %p637_p7 = scmp.lt.s32.totalorder %s628_s26, %s628_s26 }
  0x14   : > { %p619_p12 = pneg %p843_p11  ;;  %p638_p6 = por %p637_p7, %p636_p5 }
  0x16   : > { %p631_p0 = pnand %p629_p13, %p619_p12 }
  0x18   : > { %p632_p3 = pneg %p631_p0 }
  0x1a   : > { %p639_p4 = pnand %p638_p6, %p632_p3 }
  0x1c   : > { %642 = shalt.err (!%p639_p4)
}
  0x1d   : > { %s758_s27 = smov 128   ;;  %s759_s28 = smov 8  }
  0x1e   : > { %535 = dma.hbm_to_vmem [thread:$0]  (!%p843_p11), %s981_s1, 2048, %s132_s23, [#allocation8], %s758_s27, %s758_s27, %s759_s28  }
  0x1f   : > { %p33_p6 = scmp.ge.s32.totalorder %s31_s25, 2  ;;  %s40_s3 = sadd.s32 1, %s743_s11 }
  0x20   : > { %p47_p4 = scmp.ne.s32.totalorder %s743_s11, %s739_s10  ;;  %p48_p9 = scmp.eq.s32.totalorder %s755_s14, 0 }
  0x21   : > { %s1002_s25 = smov (%p33_p6, %s31_s25), 0  ;;  %p545_p0 = scmp.lt.s32.totalorder %s755_s14, 2 }
  0x22   : > { %p861_p12 = por %p48_p9, %p47_p4  ;;  %p867_p13 = por %p818_p2, %p47_p4 }
  0x23   : > { %s35_s6 = ssub.s32 %s751_s13, %s1002_s25  ;;  %s145_s7 = sand.u32 1, %s743_s11  }
  0x24   : > { %p38_p11 = scmp.eq.s32.totalorder %s35_s6, 0  ;;  %s461_s8 = sshll.u32 %s145_s7, 3 }
  0x25   : > { %s462_s16 = sshll.u32 %s751_s13, 7  ;;  %s149_s26 = scalar_lea.vmem [#allocation4], %s461_s8 }
  0x26   : > { %s876_s15 = scalar_select %p38_p11, %s743_s11, %s40_s3  }
  0x27   : > { %s155_s24 = scalar_lea.hbm %s980_s0, %s462_s16  ;;  %s157_s27 = sshll.u32 %s149_s26, 4  ;;  %s158_s27 = int_to_ptr.vmem [resolvable:$true] %s157_s27 }
  0x28   : > { %p884_p2 = pnand %p545_p0, %p861_p12  ;;  %s146_s28 = scalar_lea.sflag [#allocation5], %s145_s7 }
  0x29   : > { %s656_s29 = scalar_lea.vmem %s158_s27, 128  ;;  %s760_s30 = smov [#allocation4]  }
  0x2a   : > { %p645_p3 = pneg %p884_p2  ;;  %p657_p5 = scmp.ne.s32.totalorder %s158_s27, %s656_s29 }
  0x2b   : > { %s661_s3 = sshll.u32 %s760_s30, 4  ;;  %s662_s3 = int_to_ptr.vmem [resolvable:$false] %s661_s3 }
  0x2c   : > { %p659_p7 = pnand %p657_p5, %p645_p3  ;;  %s663_s6 = scalar_lea.vmem %s662_s3, 256 }
  0x2d   : > { %p664_p4 = scmp.lt.s32.totalorder %s158_s27, %s662_s3  ;;  %p665_p9 = scmp.lt.s32.totalorder %s663_s6, %s656_s29 }
  0x2e   : > { %p660_p6 = pneg %p659_p7 }
  0x2f   : > { %p666_p11 = por %p665_p9, %p664_p4 }
  0x31   : > { %p667_p10 = pnand %p666_p11, %p660_p6 }
  0x33   : > { %670 = shalt.err (!%p667_p10)
}
  0x34   : > { %539 = dma.hbm_to_vmem [thread:$0]  (!%p884_p2), %s155_s24, 128, %s158_s27, %s146_s28  }
  0x35   : > { %166 = sbr.rel (%p834_p8) target bundleno = 633 (0x279), region = 28  ;;  %s895_s4 = sand.u32 (!%p834_p8), 1, %s739_s10  }
  0x36   : > { %s464_s7 = sshll.u32 (!%p834_p8), %s895_s4, 3  ;;  %s169_s8 = scalar_lea.sflag (!%p834_p8), [#allocation5], %s895_s4 }
  0x37   : > { %s172_s16 = scalar_lea.vmem (!%p834_p8), [#allocation4], %s464_s7  ;;  %p993_p12 = scmp.ne.s32.totalorder (!%p834_p8), %s986_s19, 0 }
  0x3a   : > { %722 = dma.done.wait (%p993_p12), %s169_s8, 128  }
  0x3b   : > { %724 = vsyncadd (%p993_p12), %s169_s8, 4294967168 }
  0x3c   : > { %726 = dma.done.wait (%p814_p1), [#allocation8], 2048  }
  0x3d   : > { %728 = vsyncadd (%p814_p1), [#allocation8], 4294965248  ;;  %v761_v0 = vmov 0   ;;  %v762_v1 = vmov 0.0   ;;  %v910_v2 = vld [vmem:[%s172_s16] sm:$0xff]  ;;  %v243_v6 = vld [vmem:[#allocation7 + $0x68] sm:$0xff]  ;;  %v346_v49 = vlaneseq }
  0x3e   : > { %602 = vset.pattern.permute.xlu0 %v761_v0  ;;  %489 = vmatprep.subr.mxu0 %v762_v1  ;;  %v245_v3 = vld [vmem:[#allocation7 + $0x78] sm:$0xff]  ;;  %v244_v4 = vld [vmem:[#allocation7 + $0x70] sm:$0xff]  ;;  %v204_v5 = vmul.f32 %v910_v2, %v910_v2  ;;  %v242_v8 = vld [vmem:[#allocation7 + $0x60] sm:$0xff]  ;;  %vm219_vm2 = vcmask 7168   ;;  %vm763_vm3 = vmmov 0   ;;  %s469_s17 = sshll.u32 %s747_s12, 7 }
  0x3f   : > { %490 = vmatpush3.msra.mxu0 %v245_v3  ;;  %v241_v10 = vld [vmem:[#allocation7 + $0x58] sm:$0xff]  ;;  %v240_v11 = vld [vmem:[#allocation7 + $0x50] sm:$0xff]  ;;  %v239_v12 = vld [vmem:[#allocation7 + $0x48] sm:$0xff]  ;;  %521 = vmatprep.mubr.msk.f32.mxu0 %vm763_vm3, %v762_v1  ;;  %v347_v53 = vand.u32 127, %v346_v49  ;;  %s196_s19 = scalar_lea.vmem [#allocation9], %s464_s7  ;;  %s938_s24 = scalar_lea.hbm %s982_s2, %s469_s17 }
  0x40   : > { %491 = vmatprep.subr.mxu0 %v762_v1  ;;  %v467_v7 = vadd.f32 -1.0, %v204_v5  ;;  %v238_v13 = vld [vmem:[#allocation7 + $0x40] sm:$0xff]  ;;  %v237_v14 = vld [vmem:[#allocation7 + $0x38] sm:$0xff]  ;;  %v236_v15 = vld [vmem:[#allocation7 + $0x30] sm:$0xff]  ;;  %s365_s21 = sshll.u32 %s196_s19, 4  ;;  %s352_s26 = scalar_lea.sflag [#allocation6], %s895_s4  ;;  %s366_s21 = int_to_ptr.vmem [resolvable:$true] %s365_s21 }
  0x41   : > { %492 = vmatpush3.msra.mxu0 %v244_v4  ;;  %v235_v16 = vld [vmem:[#allocation7 + $0x28] sm:$0xff]  ;;  %v234_v19 = vld [vmem:[#allocation7 + $0x20] sm:$0xff]  ;;  %v233_v21 = vld [vmem:[#allocation7 + $0x18] sm:$0xff]  ;;  %vm348_vm6 = vcmp.eq.s32.totalorder %v347_v53, 0  ;;  %s671_s27 = scalar_lea.vmem %s366_s21, 128  ;;  %s764_s12 = smov [#allocation9]  }
  0x42   : > { %493 = vmatprep.subr.mxu0 %v762_v1  ;;  %v206_v9 = vmax.f32 %v467_v7, 1e-07  ;;  %v232_v24 = vld [vmem:[#allocation7 + $0x10] sm:$0xff]  ;;  %v231_v26 = vld [vmem:[#allocation7 + $0x8] sm:$0xff]  ;;  %v230_v31 = vld [vmem:[#allocation7] sm:$0xff]  ;;  %p672_p1 = scmp.ne.s32.totalorder %s366_s21, %s671_s27  ;;  %s675_s18 = sshll.u32 %s764_s12, 4  ;;  %s676_s18 = int_to_ptr.vmem [resolvable:$false] %s675_s18 }
  0x43   : > { %494 = vmatpush3.msra.mxu0 %v243_v6  ;;  %s677_s28 = scalar_lea.vmem %s676_s18, 256  ;;  %p678_p0 = scmp.lt.s32.totalorder %s366_s21, %s676_s18 }
  0x44   : > { %495 = vmatprep.subr.mxu0 %v762_v1  ;;  %603 = vrsqrt.f32 %v206_v9  ;;  %vm209_vm0 = vcmp.eq.f32.partialorder %v206_v9, inf  ;;  %v212_v18 = vand.u32 2147483648, %v206_v9  ;;  %vm211_vm1 = vcmp.eq.f32.partialorder %v206_v9, 0.0  ;;  %p673_p8 = pnand %p672_p1, %p867_p13  ;;  %p679_p2 = scmp.lt.s32.totalorder %s677_s28, %s671_s27 }
  0x45   : > { %496 = vmatpush3.msra.mxu0 %v242_v8 }
  0x46   : > { %497 = vmatprep.subr.mxu0 %v762_v1  ;;  %p674_p10 = pneg %p673_p8  ;;  %p680_p3 = por %p679_p2, %p678_p0 }
  0x47   : > { %498 = vmatpush3.msra.mxu0 %v241_v10 }
  0x48   : > { %499 = vmatprep.subr.mxu0 %v762_v1  ;;  %p681_p5 = pnand %p680_p3, %p674_p10 }
  0x49   : > { %500 = vmatpush3.msra.mxu0 %v240_v11 }
  0x4a   : > { %501 = vmatprep.subr.mxu0 %v762_v1 }
  0x4b   : > { %502 = vmatpush3.msra.mxu0 %v239_v12 }
  0x4c   : > { %503 = vmatprep.subr.mxu0 %v762_v1 }
  0x4d   : > { %504 = vmatpush3.msra.mxu0 %v238_v13 }
  0x4e   : > { %505 = vmatprep.subr.mxu0 %v762_v1 }
  0x4f   : > { %506 = vmatpush3.msra.mxu0 %v237_v14 }
  0x50   : > { %507 = vmatprep.subr.mxu0 %v762_v1 }
  0x51   : > { %508 = vmatpush3.msra.mxu0 %v236_v15  ;;  %v604_v17 = vpop.eup %603 }
  0x52   : > { %509 = vmatprep.subr.mxu0 %v762_v1  ;;  %v208_v20 = vmul.f32 %v604_v17, %v206_v9 }
  0x53   : > { %510 = vmatpush3.msra.mxu0 %v235_v16 }
  0x54   : > { %511 = vmatprep.subr.mxu0 %v762_v1  ;;  %v210_v22 = vsel %vm209_vm0, %v206_v9, %v208_v20 }
  0x55   : > { %512 = vmatpush3.msra.mxu0 %v234_v19  ;;  %v213_v23 = vsel %vm211_vm1, %v212_v18, %v210_v22 }
  0x56   : > { %513 = vmatprep.subr.mxu0 %v762_v1  ;;  %v214_v25 = vadd.f32 %v213_v23, %v910_v2  ;;  %605 = vrcp.f32 %v213_v23 }
  0x57   : > { %514 = vmatpush3.msra.mxu0 %v233_v21 }
  0x58   : > { %515 = vmatprep.subr.mxu0 %v762_v1  ;;  %607 = vlog2.f32 %v214_v25 }
  0x59   : > { %516 = vmatpush3.msra.mxu0 %v232_v24 }
  0x5a   : > { %517 = vmatprep.subr.mxu0 %v762_v1 }
  0x5b   : > { %518 = vmatpush3.msra.mxu0 %v231_v26 }
  0x5c   : > { %519 = vmatprep.subr.mxu0 %v762_v1 }
  0x5d   : > { %520 = vmatpush3.msra.mxu0 %v230_v31 }
  0x63   : > { %v606_v27 = vpop.eup %605 }
  0x65   : > { %v608_v28 = vpop.eup %607 }
  0x66   : > { %v216_v29 = vmul.f32 0.6931472, %v608_v28 }
  0x68   : > { %v218_v30 = vmul.f32 %v606_v27, %v216_v29 }
  0x6a   : > { %220 = vst.msk [vmem:[#allocation3] sm:$0xff] %vm219_vm2, %v218_v30 }
  0x71   : > { %v221_v32 = vld [vmem:[#allocation3] sm:$0xff] }
  0x72   : > { %225 = vperm.xlu0 %602, %v221_v32  }
  0xed   : > { %v226_v33 = vpop.permute.xlu0 %225 }
  0xee   : > { %v228_v34 = vmul.f32 %v226_v33, %v910_v2 }
  0xf0   : > { %522 = vmatmul.mubr.f32.vlgmr.msra.gmra.mxu0 %v228_v34 }
 0x1b0   : > { %v312_v35 = vpop.f32.mrf.mxu0 }
 0x1b1   : > { %v322_v36 = vmax.f32 %v312_v35, 0.0 }
 0x1b2   : > { %v523_v37 = vpop.f32.mrf.mxu0 }
 0x1b3   : > { %v323_v38 = vmul.f32 %v322_v36, %v322_v36 }
 0x1b5   : > { %324 = vadd.xlane.f32.xlu0 %v323_v38 }
 0x23e   : > { %v325_v39 = vpop.xlane.xlu0 %324 }
 0x23f   : > { %609 = vrsqrt.f32 %v325_v39  ;;  %vm328_vm4 = vcmp.eq.f32.partialorder %v325_v39, inf  ;;  %v331_v42 = vand.u32 2147483648, %v325_v39  ;;  %vm330_vm5 = vcmp.eq.f32.partialorder %v325_v39, 0.0 }
 0x24c   : > { %v610_v40 = vpop.eup %609 }
 0x24d   : > { %v327_v41 = vmul.f32 %v610_v40, %v325_v39 }
 0x24f   : > { %v329_v43 = vsel %vm328_vm4, %v325_v39, %v327_v41 }
 0x250   : > { %v332_v44 = vsel %vm330_vm5, %v331_v42, %v329_v43 }
 0x251   : > { %v333_v45 = vmul.f32 1.442695, %v332_v44  ;;  %v335_v46 = vsub.f32 0.0, %v332_v44  ;;  %v342_v48 = vmax.f32 %v332_v44, 1e-12 }
 0x253   : > { %v336_v47 = vmul.f32 1.442695, %v335_v46  ;;  %611 = vpow2.f32 %v333_v45 }
 0x255   : > { %613 = vpow2.f32 %v336_v47 }
 0x256   : > { %615 = vrcp.f32 %v342_v48 }
 0x260   : > { %v612_v50 = vpop.eup %611 }
 0x262   : > { %v614_v51 = vpop.eup %613 }
 0x263   : > { %v340_v52 = vsub.f32 %v612_v50, %v614_v51  ;;  %v338_v54 = vadd.f32 %v614_v51, %v612_v50  ;;  %v616_v56 = vpop.eup %615 }
 0x265   : > { %v341_v55 = vmul.f32 0.5, %v340_v52  ;;  %v339_v58 = vmul.f32 0.5, %v338_v54 }
 0x267   : > { %v344_v57 = vmul.f32 %v616_v56, %v341_v55 }
 0x269   : > { %v345_v59 = vmul.f32 %v344_v57, %v322_v36 }
 0x26b   : > { %v349_v60 = vsel %vm348_vm6, %v339_v58, %v345_v59 }
 0x26c   : > { %350 = vst [vmem:[%s196_s19] sm:$0xff] %v349_v60 }
 0x26d   : > { %684 = shalt.err (!%p681_p5)
}
 0x26e   : > { %s685_s29 = scalar_lea.hbm %s938_s24, 128  ;;  %s689_s6 = scalar_lea.hbm %s982_s2, 256 }
 0x26f   : > { %p686_p7 = scmp.ne.s32.totalorder %s938_s24, %s685_s29  ;;  %p690_p9 = scmp.lt.s32.totalorder %s938_s24, %s982_s2 }
 0x270   : > { %p691_p11 = scmp.lt.s32.totalorder %s689_s6, %s685_s29 }
 0x271   : > { %p687_p6 = pnand %p686_p7, %p867_p13 }
 0x272   : > { %p692_p12 = por %p691_p11, %p690_p9 }
 0x273   : > { %p688_p4 = pneg %p687_p6 }
 0x275   : > { %p693_p1 = pnand %p692_p12, %p688_p4 }
 0x277   : > { %696 = shalt.err (!%p693_p1)
}
 0x278   : > { %530 = dma.vmem_to_hbm [thread:$0]  (%p867_p13), %s366_s21, 128, %s938_s24, %s352_s26  }
 0x279 PF: > { %s377_s8 = sand.u32 1, %s735_s9   ;;  %p994_p8 = scmp.ne.s32.totalorder %s987_s20, 0 }
 0x27a   : > { %p995_p10 = scmp.ge.s32.totalorder %s755_s14, 2  ;;  %s378_s16 = scalar_lea.sflag [#allocation6], %s377_s8 }
 0x27c   : > { %p541_p0 = pnand %p995_p10, %p994_p8 }
 0x27e   : > { %p542_p2 = pneg %p541_p0 }
 0x280   : > { %730 = dma.done.wait (%p542_p2), %s378_s16, 128  }
 0x281   : > { %732 = vsyncadd (%p542_p2), %s378_s16, 4294967168  ;;  %s19_s14 = sadd.s32 1, %s755_s14   ;;  %s996_s9 = smov %s739_s10 }
 0x282   : > { %p16_p3 = scmp.ge.s32.totalorder %s19_s14, 4   ;;  %s997_s10 = smov %s743_s11 }
 0x283   : > { %s998_s11 = smov %s876_s15  ;;  %s999_s12 = smov %s751_s13 }
 0x284   : > { %s1000_s13 = smov %s1002_s25  ;;  %18 = sbr.rel (!%p16_p3) target bundleno = 7 (0x7), region = 86 }
 0x289   :  { %383 = vsyncpa [#allocation5], 1 }
 0x28a   :  { %385 = vsyncpa [#allocation5 + $0x1], 1 }
 0x28b   :  { %386 = vsyncpa [#allocation8], 1 }
 0x28c   :  { %387 = vsyncpa [#allocation6], 1 }
 0x28d   :  { %389 = vsyncpa [#allocation6 + $0x1], 1 }

</bundles_post_ra>
